<compile_context>
chip_gen: v7x
topology: tpu7x:2x2x1
jax: 0.10.0
libtpu: 0.0.40
codegen_flags: <defaults>
</compile_context>

<pallas_src>
import jax
import jax.numpy as jnp
from jax import lax
from jax.experimental import pallas as pl
from jax.experimental.pallas import tpu as pltpu

KH = KW = 5
STRIDE = 2
IN_C = 3
OUT_C = 32

_TILE_BYTES = 16 * 1024 * 1024       # per input batch tile (Pallas double-buffers)
_VMEM_LIMIT = 48 * 1024 * 1024       # 2x tile + resident coeff + margin; <= v7x 64 MiB
_MIN_SPLIT_BYTES = 1 * 1024 * 1024   # only go multi-block if each block streams >= this


def _weighted_sum_kernel(x_ref, c_ref, o_ref):
    # x_ref: (TB, N) raw flattened NCHW input tile, native dtype   (VMEM)
    # c_ref: (1,  N) folded conv-weight coefficient map, f32       (VMEM, resident)
    # o_ref: (TB, 1) per-example totals (bias added outside)       (VMEM)
    x = x_ref[...].astype(jnp.float32)   # in-kernel cast: VPU has huge slack
    o_ref[...] = jnp.sum(x * c_ref[...], axis=1, keepdims=True)


def _fold_weights(weight, H, W, Ho, Wo):
    """coeff[c,h,w] = sum_oc sum_{(kh,kw) windows covering (h,w)} W[oc,c,kh,kw]."""
    wsum = jnp.sum(weight.astype(jnp.float32), axis=0)          # (IN_C, KH, KW)
    coeff = jnp.zeros((IN_C, H, W), jnp.float32)
    for kh in range(KH):
        for kw in range(KW):
            coeff = coeff.at[:, kh:kh + STRIDE * (Ho - 1) + 1:STRIDE,
                                kw:kw + STRIDE * (Wo - 1) + 1:STRIDE].add(
                wsum[:, kh, kw][:, None, None])
    return coeff


def _choose_tb(B, row_bytes):
    """Batch tile size.  Invariant: TB is a multiple of 8 OR TB == B."""
    total = B * row_bytes
    if total <= 2 * _MIN_SPLIT_BYTES:
        return B                                  # trivial: one full-batch block
    tb_vmem = max(8, (_TILE_BYTES // row_bytes) // 8 * 8)   # VMEM budget
    tb_split = ((pl.cdiv(B, 2) + 7) // 8) * 8               # aim for >=2 blocks (v7x)
    return min(min(tb_vmem, tb_split), B)


def qmodel_forward(state_nchw, weight, bias):
    """state_nchw: (B, 3, H, W); weight: (32, 3, 5, 5); bias: (32,) -> (B,) f32."""
    B, C, H, W = state_nchw.shape
    assert C == IN_C
    Ho = (H - KH) // STRIDE + 1
    Wo = (W - KW) // STRIDE + 1
    P = Ho * Wo
    N = C * H * W
    itemsize = jnp.dtype(state_nchw.dtype).itemsize

    # Weight-only preprocessing (tiny, independent of batch traffic).
    coeff = _fold_weights(weight, H, W, Ho, Wo).reshape(1, N)
    # Bias contributes exactly Ho*Wo*sum(bias) per example: single scalar.
    bias_term = jnp.float32(P) * jnp.sum(bias.astype(jnp.float32))

    # Raw input, flattened, NATIVE dtype (free view of contiguous NCHW).
    # No wrapper-side cast, no im2col, no padding copy.
    x2d = state_nchw.reshape(B, N)

    TB = _choose_tb(B, N * itemsize)
    nb = pl.cdiv(B, TB)   # last input block may be ragged: garbage rows land in
                          # output rows >= B and are sliced off below.

    y = pl.pallas_call(
        _weighted_sum_kernel,
        out_shape=jax.ShapeDtypeStruct((nb * TB, 1), jnp.float32),
        grid=(nb,),
        in_specs=[
            pl.BlockSpec((TB, N), lambda i: (i, 0)),   # raw input batch tile
            pl.BlockSpec((1, N), lambda i: (0, 0)),    # folded weights (resident)
        ],
        out_specs=pl.BlockSpec((TB, 1), lambda i: (i, 0)),
        compiler_params=pltpu.CompilerParams(
            dimension_semantics=("parallel",),          # shard batch across v7x TCs
            vmem_limit_bytes=_VMEM_LIMIT),
        cost_estimate=pl.CostEstimate(
            flops=2 * B * N,
            bytes_accessed=B * N * itemsize + N * 4 + nb * TB * 4,
            transcendentals=0),
    )(x2d, coeff)

    # Keep this slice: it also discards the garbage sums from the ragged last block.
    return y[:B, 0] + bias_term


if __name__ == "__main__":
    key = jax.random.PRNGKey(0)
    k_state, k_w, k_b = jax.random.split(key, 3)

    B, H, W = 2, 16, 16
    state = jax.random.normal(k_state, (B, IN_C, H, W), dtype=jnp.float32)

    # Deterministic parameter init (PyTorch-style uniform(-1/sqrt(fan_in), ...)).
    fan_in = IN_C * KH * KW
    bound = 1.0 / (fan_in ** 0.5)
    weight = jax.random.uniform(k_w, (OUT_C, IN_C, KH, KW),
                                minval=-bound, maxval=bound, dtype=jnp.float32)
    bias = jax.random.uniform(k_b, (OUT_C,),
                              minval=-bound, maxval=bound, dtype=jnp.float32)

    out = jax.jit(qmodel_forward)(state, weight, bias)
    out = jax.block_until_ready(out)

    # Plain-JAX reference of the PyTorch forward for correctness.
    ref = lax.conv_general_dilated(
        state, weight, window_strides=(STRIDE, STRIDE), padding="VALID",
        dimension_numbers=("NCHW", "OIHW", "NCHW"),
        precision=lax.Precision.HIGHEST)
    ref = ref + bias[None, :, None, None]
    ref = ref.reshape(B, -1).sum(axis=1)

    assert out.shape == (B,)
    # Summation order is reassociated vs. the conv reference; keep loose tolerance.
    assert jnp.allclose(out, ref, rtol=1e-3, atol=1e-2), (out, ref)
    print("KERNEL_OK")
</pallas_src>

<mosaic_0001>
module attributes {stable_mosaic.version = 11 : i64} {
  func.func @_weighted_sum_kernel(%arg0: i32, %arg1: memref<2x768xf32, #tpu.memory_space<vmem>>, %arg2: memref<1x768xf32, #tpu.memory_space<vmem>>, %arg3: memref<2x1xf32, #tpu.memory_space<vmem>>) attributes {dimension_semantics = [#tpu.dimension_semantics<parallel>], iteration_bounds = array<i64: 1>, scalar_prefetch = 0 : i64, scratch_operands = 0 : i64, tpu.core_type = #tpu.core_type<tc>, window_params = [{transform_indices = @transform_0, window_bounds = array<i64: 2, 768>}, {pipeline_mode = #tpu.pipeline_mode<synchronous>, transform_indices = @transform_1, window_bounds = array<i64: 1, 768>}, {transform_indices = @transform_2, window_bounds = array<i64: 2, 1>}]} {
    %c0 = arith.constant 0 : index
    %c0_0 = arith.constant 0 : index
    %0 = vector.load %arg1[%c0, %c0_0] : memref<2x768xf32, #tpu.memory_space<vmem>>, vector<2x768xf32>
    %c0_1 = arith.constant 0 : index
    %c0_2 = arith.constant 0 : index
    %1 = vector.load %arg2[%c0_1, %c0_2] : memref<1x768xf32, #tpu.memory_space<vmem>>, vector<1x768xf32>
    %2 = vector.broadcast %1 : vector<1x768xf32> to vector<2x768xf32>
    %3 = arith.mulf %0, %2 : vector<2x768xf32>
    %cst = arith.constant dense<0.000000e+00> : vector<2xf32>
    %4 = vector.multi_reduction <add>, %3, %cst [1] : vector<2x768xf32> to vector<2xf32>
    %5 = vector.shape_cast %4 : vector<2xf32> to vector<2x1xf32>
    %c0_3 = arith.constant 0 : index
    %c0_4 = arith.constant 0 : index
    %6 = vector.load %arg3[%c0_3, %c0_4] : memref<2x1xf32, #tpu.memory_space<vmem>>, vector<2x1xf32>
    tpu.vector_store %arg3[%c0_3, %c0_4], %5 {strides = array<i32>} : memref<2x1xf32, #tpu.memory_space<vmem>>, vector<2x1xf32>,
    return
  }
  func.func @transform_0(%arg0: i32) -> (i32, i32) {
    %c0_i32 = arith.constant 0 : i32
    %c0_i32_0 = arith.constant 0 : i32
    return %arg0, %c0_i32 : i32, i32
  }
  func.func @transform_1(%arg0: i32) -> (i32, i32) {
    %c0_i32 = arith.constant 0 : i32
    %c0_i32_0 = arith.constant 0 : i32
    %c0_i32_1 = arith.constant 0 : i32
    return %c0_i32, %c0_i32_0 : i32, i32
  }
  func.func @transform_2(%arg0: i32) -> (i32, i32) {
    %c0_i32 = arith.constant 0 : i32
    %c0_i32_0 = arith.constant 0 : i32
    return %arg0, %c0_i32 : i32, i32
  }
}

</mosaic_0001>

<bundles_post_ra>
// kernel: qmodel_forward.1
= control target key start
LH: loop header
LB: loop body
LE: loop exit
PB: predicated region body
PF: predicated region fallthrough
CT: control target
= control target key end

     0   :  { %v15_v0 = vlaneseq  ;;  %v122_v1 = vmov 1983009808   ;;  %vm101_vm0 = vcmask 1041408   ;;  %vm115_vm1 = vcmask 1024   ;;  %s156_s1 = inlined_call_operand.vmem [shape: f32[1,768], index: 1, kind: input, shape index: {}]   ;;  %s157_s0 = inlined_call_operand.vmem [shape: f32[2,768], index: 0, kind: input, shape index: {}]   ;;  %s158_s2 = inlined_call_operand.vmem [shape: f32[2,1], index: 2, kind: output, shape index: {}]  }
   0x1   :  { %v42_v2 = vunpack.c.l.s4 %v122_v1  ;;  %v13_v4 = vld [vmem:[%s156_s1] sm:$0x3f]  ;;  %v12_v25 = vld [vmem:[%s157_s0 + $0x8] sm:$0xf] }
   0x2   :  { %v16_v3 = vshrl.u32 %v15_v0, 7  ;;  %v11_v24 = vld [vmem:[%s157_s0] sm:$0xff] }
   0x3   :  { %v43_v5 = vunpack.c.0.s8 %v42_v2 }
   0x4   :  { %v17_v6 = vsub.s32 0, %v16_v3  ;;  %v21_v7 = vsub.s32 1, %v16_v3  ;;  %v25_v8 = vsub.s32 2, %v16_v3  ;;  %v29_v9 = vsub.s32 3, %v16_v3 }
   0x5   :  { %v33_v10 = vsub.s32 4, %v16_v3  ;;  %v37_v11 = vsub.s32 5, %v16_v3  ;;  %v46_v12 = vsub.s32 %v43_v5, %v16_v3 }
   0x6   :  { %v18_v13 = vrot.slane %v13_v4, %v17_v6  ;;  %v22_v14 = vrot.slane %v13_v4, %v21_v7  ;;  %v26_v15 = vrot.slane %v13_v4, %v25_v8  ;;  %v30_v16 = vrot.slane %v13_v4, %v29_v9 }
   0x7   :  { %v34_v17 = vrot.slane %v13_v4, %v33_v10  ;;  %v38_v18 = vrot.slane %v13_v4, %v37_v11 }
   0x8   :  { %v39_v19 = vcombine.low %v18_v13, %v22_v14  ;;  %v40_v20 = vcombine.low %v26_v15, %v30_v16 }
   0x9   :  { %v56_v21 = vcombine.low %v34_v17, %v38_v18 }
   0xa   :  { %v47_v22 = vrot.slane %v39_v19, %v46_v12  ;;  %v54_v23 = vrot.slane %v40_v20, %v46_v12 }
   0xb   :  { %v63_v26 = vrot.slane %v56_v21, %v46_v12 }
   0xc   :  { %v55_v27 = vcombine.low %v47_v22, %v54_v23 }
   0xd   :  { %v67_v29 = vmul.f32 %v63_v26, %v12_v25 }
   0xe   :  { %v66_v28 = vmul.f32 %v55_v27, %v11_v24 }
   0xf   :  { %v93_v34 = vrot.slane %v67_v29, %v46_v12 }
  0x10   :  { %v70_v30 = vcombine.high %v66_v28, %v66_v28  ;;  %v77_v31 = vrot.slane %v66_v28, %v46_v12 }
  0x11   :  { %v94_v40 = vcombine.high %v93_v34, %v93_v34  ;;  %v109_v43 = vsel %vm101_vm0, %v93_v34, 0.0 }
  0x12   :  { %v84_v32 = vrot.slane %v70_v30, %v46_v12  ;;  %v85_v33 = vcombine.high %v77_v31, %v77_v31  ;;  %v102_v35 = vsel %vm101_vm0, %v77_v31, 0.0 }
  0x13   :  { %v111_v45 = vsel %vm101_vm0, %v94_v40, 0.0 }
  0x14   :  { %v86_v36 = vcombine.high %v84_v32, %v84_v32  ;;  %v103_v37 = vsel %vm101_vm0, %v85_v33, 0.0  ;;  %v105_v38 = vsel %vm101_vm0, %v84_v32, 0.0 }
  0x15   :  { %v104_v39 = vadd.f32 %v103_v37, %v102_v35 }
  0x16   :  { %v107_v41 = vsel %vm101_vm0, %v86_v36, 0.0 }
  0x17   :  { %v106_v42 = vadd.f32 %v105_v38, %v104_v39 }
  0x19   :  { %v108_v44 = vadd.f32 %v107_v41, %v106_v42 }
  0x1b   :  { %v110_v46 = vadd.f32 %v109_v43, %v108_v44 }
  0x1d   :  { %v112_v47 = vadd.f32 %v111_v45, %v110_v46 }
  0x1f   :  { %113 = vadd.xlane.f32.xlu0 %v112_v47 }
  0xac   :  { %v114_v48 = vpop.xlane.xlu0 %113 }
  0xad   :  { %116 = vst.msk [vmem:[%s158_s2] sm:$0x3] %vm115_vm1, %v114_v48 }

</bundles_post_ra>
